<compile_context>
chip_gen: v7x
topology: tpu7x:2x2x1
jax: 0.10.0
libtpu: 0.0.40
codegen_flags: <defaults>
</compile_context>

<pallas_src>
import jax
import jax.numpy as jnp
import numpy as np
from jax.experimental import pallas as pl
from jax.experimental.pallas import tpu as pltpu

_LANES = 128
_SUBLANES = 8
_MAX_COLS = 64 * _LANES  # cap lane width of a tile (8192 lanes, 32 KiB/row f32)


def _identity_kernel(x_ref, o_ref):
    # Empty nn.Sequential == identity: pure ref-to-ref copy. No VPU work, so
    # the kernel is purely HBM-bandwidth-bound on every generation.
    o_ref[...] = x_ref[...]


def _vmem_budget():
    """Return (target_tile_bytes, vmem_limit_bytes) tuned per TPU generation."""
    try:
        cap = int(pltpu.get_tpu_info().vmem_capacity_bytes)
    except Exception:
        cap = 64 * 1024 * 1024  # conservative default (v7x-sized VMEM)
    if cap >= 128 * 1024 * 1024:
        # v5e / v6e: 128 MiB physical — 16 MiB tiles (2 arrays x 2 buffers =
        # 64 MiB live) keep per-grid-step overhead < 2% of HBM roofline.
        return 16 * 1024 * 1024, 96 * 1024 * 1024
    # v7x: 64 MiB physical — 8 MiB tiles (32 MiB live), limit at 48 MiB leaves
    # headroom for Mosaic internal scratch instead of claiming all of VMEM.
    return 8 * 1024 * 1024, 48 * 1024 * 1024


def _dense_layout(total, itemsize, target_tile_bytes):
    """Pick (rows, cols, row_tile) for a lane-dense 2-D slab.

    Only requires total % 128 == 0.  cols is the widest multiple of 128 that
    divides `total` (capped at _MAX_COLS); rows need NOT be a multiple of the
    row tile — the grid uses pl.cdiv and Pallas bounds the ragged last tile.
    """
    if total % _LANES != 0:
        return None
    cols = None
    c = _LANES
    limit = min(total, _MAX_COLS)
    while c <= limit:
        if total % c == 0:
            cols = c  # prefer the widest (most lane-dense) option
        c += _LANES
    if cols is None:
        return None
    rows = total // cols
    if rows < _SUBLANES:
        # Full-extent first dim is always a legal block shape.
        row_tile = rows
    else:
        budget_rows = (target_tile_bytes // (cols * itemsize)) // _SUBLANES * _SUBLANES
        row_tile = max(_SUBLANES, min(budget_rows, (rows // _SUBLANES) * _SUBLANES))
    return rows, cols, row_tile


def _materialized_copy(x, target_tile_bytes, vmem_limit_bytes):
    """Tiled, software-pipelined HBM->HBM copy producing a fresh buffer."""
    shape = x.shape
    total = int(np.prod(shape))
    itemsize = jnp.dtype(x.dtype).itemsize

    layout = _dense_layout(total, itemsize, target_tile_bytes)

    if layout is not None:
        rows, cols, row_tile = layout
        x2d = x.reshape(rows, cols)  # lane/sublane-dense slab
        grid = (pl.cdiv(rows, row_tile),)
        out2d = pl.pallas_call(
            _identity_kernel,
            out_shape=jax.ShapeDtypeStruct((rows, cols), x2d.dtype),
            grid_spec=pltpu.PrefetchScalarGridSpec(
                num_scalar_prefetch=0,
                grid=grid,
                in_specs=[pl.BlockSpec((row_tile, cols), lambda i: (i, 0))],
                out_specs=pl.BlockSpec((row_tile, cols), lambda i: (i, 0)),
            ),
            compiler_params=pltpu.CompilerParams(
                # Independent row tiles: shard across both TensorCores on v7x
                # (measured-neutral on single-TC v5e/v6e).
                dimension_semantics=("parallel",),
                vmem_limit_bytes=vmem_limit_bytes,
            ),
        )(x2d)
        return out2d.reshape(shape)

    # Fallback: flattened size not divisible by 128. Tile the flat array 1-D
    # with a bounded ragged tail so large inputs never exceed scoped VMEM.
    flat = x.reshape(-1)
    chunk = max(
        _SUBLANES * _LANES,
        (target_tile_bytes // itemsize) // (_SUBLANES * _LANES) * (_SUBLANES * _LANES),
    )
    if total <= chunk:
        out = pl.pallas_call(
            _identity_kernel,
            out_shape=jax.ShapeDtypeStruct(flat.shape, flat.dtype),
            compiler_params=pltpu.CompilerParams(
                vmem_limit_bytes=vmem_limit_bytes,
            ),
        )(flat)
    else:
        out = pl.pallas_call(
            _identity_kernel,
            out_shape=jax.ShapeDtypeStruct(flat.shape, flat.dtype),
            grid_spec=pltpu.PrefetchScalarGridSpec(
                num_scalar_prefetch=0,
                grid=(pl.cdiv(total, chunk),),
                in_specs=[pl.BlockSpec((chunk,), lambda i: (i,))],
                out_specs=pl.BlockSpec((chunk,), lambda i: (i,)),
            ),
            compiler_params=pltpu.CompilerParams(
                dimension_semantics=("parallel",),
                vmem_limit_bytes=vmem_limit_bytes,
            ),
        )(flat)
    return out.reshape(shape)


def image_classifier_forward(x_nchw: jax.Array, *, materialize: bool = False) -> jax.Array:
    """Forward pass of ImageClassifier (empty nn.Sequential == identity).

    Default: short-circuit — return `x_nchw` unchanged.  The module owns no
    parameters and applies no transform, so the optimal implementation moves
    zero bytes of HBM traffic (per the performance review).

    materialize=True: run a Pallas tiled copy kernel instead, producing a
    fresh output buffer that does not alias the input (useful if downstream
    code mutates/donates buffers).
    """
    if not materialize:
        return x_nchw

    target_tile_bytes, vmem_limit_bytes = _vmem_budget()
    return _materialized_copy(x_nchw, target_tile_bytes, vmem_limit_bytes)


if __name__ == "__main__":
    key = jax.random.PRNGKey(0)

    # Small shapes consistent with an image classifier input (NCHW).
    B, C, H, W = 2, 4, 16, 16
    input_size = C * H * W      # 1024
    output_size = 10            # unused: the module has no layers/parameters

    x = jax.random.normal(key, (B, C, H, W), dtype=jnp.float32)
    x_host = np.asarray(x)      # host copy for verification

    # Default path: identity short-circuit (no kernel launch, zero HBM traffic).
    y_fast = image_classifier_forward(x)
    jax.block_until_ready(y_fast)
    assert y_fast.shape == x_host.shape and y_fast.dtype == x_host.dtype
    assert np.array_equal(np.asarray(y_fast), x_host)

    # Pallas path: materialize a fresh output via the tuned tiled-copy kernel.
    y = image_classifier_forward(x, materialize=True)
    jax.block_until_ready(y)
    assert y.shape == x_host.shape and y.dtype == x_host.dtype
    assert np.array_equal(np.asarray(y), x_host)

    print("KERNEL_OK")
</pallas_src>

<mosaic_0001>
module attributes {stable_mosaic.version = 11 : i64} {
  func.func @_identity_kernel(%arg0: i32, %arg1: memref<1x2048xf32, #tpu.memory_space<vmem>>, %arg2: memref<1x2048xf32, #tpu.memory_space<vmem>>) attributes {dimension_semantics = [#tpu.dimension_semantics<parallel>], iteration_bounds = array<i64: 1>, scalar_prefetch = 0 : i64, scratch_operands = 0 : i64, tpu.core_type = #tpu.core_type<tc>, window_params = [{transform_indices = @transform_0, window_bounds = array<i64: 1, 2048>}, {transform_indices = @transform_1, window_bounds = array<i64: 1, 2048>}]} {
    %c0 = arith.constant 0 : index
    %c0_0 = arith.constant 0 : index
    %0 = vector.load %arg1[%c0, %c0_0] : memref<1x2048xf32, #tpu.memory_space<vmem>>, vector<1x2048xf32>
    %c0_1 = arith.constant 0 : index
    %c0_2 = arith.constant 0 : index
    %1 = vector.load %arg2[%c0_1, %c0_2] : memref<1x2048xf32, #tpu.memory_space<vmem>>, vector<1x2048xf32>
    tpu.vector_store %arg2[%c0_1, %c0_2], %0 {strides = array<i32>} : memref<1x2048xf32, #tpu.memory_space<vmem>>, vector<1x2048xf32>,
    return
  }
  func.func @transform_0(%arg0: i32) -> (i32, i32) {
    %c0_i32 = arith.constant 0 : i32
    %c0_i32_0 = arith.constant 0 : i32
    return %arg0, %c0_i32 : i32, i32
  }
  func.func @transform_1(%arg0: i32) -> (i32, i32) {
    %c0_i32 = arith.constant 0 : i32
    %c0_i32_0 = arith.constant 0 : i32
    return %arg0, %c0_i32 : i32, i32
  }
}

</mosaic_0001>

<bundles_post_ra>
// kernel: tpu_custom_call.1
= control target key start
LH: loop header
LB: loop body
LE: loop exit
PB: predicated region body
PF: predicated region fallthrough
CT: control target
= control target key end

     0   :  { %6 = vsyncpa [#allocation3], 0  ;;  %s126_s0 = inlined_call_operand.hbm [shape: f32[1,2048], index: 0, kind: input, shape index: {}]   ;;  %s127_s1 = inlined_call_operand.hbm [shape: f32[1,2048], index: 1, kind: output, shape index: {}]  }
   0x1   :  { %7 = vsyncpa [#allocation4], 0  ;;  %s90_s6 = smov [#allocation2]   ;;  %s42_s10 = scalar_lea.hbm %s126_s0, 256 }
   0x2   :  { %s14_s7 = sshll.u32 %s90_s6, 4  ;;  %p43_p0 = scmp.ne.s32.totalorder %s126_s0, %s42_s10  ;;  %s15_s7 = int_to_ptr.vmem [resolvable:$true] %s14_s7 }
   0x3   :  { %p46_p1 = scmp.lt.u32.totalorder %s42_s10, %s126_s0 }
   0x5   :  { %p48_p2 = pnand %p46_p1, %p43_p0 }
   0x7   :  { %51 = shalt.err (!%p48_p2)
}
   0x8   :  { %s52_s15 = scalar_lea.vmem %s15_s7, 256  ;;  %p57_p4 = scmp.lt.s32.totalorder %s15_s7, %s15_s7 }
   0x9   :  { %p53_p3 = scmp.ne.s32.totalorder %s15_s7, %s52_s15  ;;  %p58_p5 = scmp.lt.s32.totalorder %s52_s15, %s52_s15 }
   0xb   :  { %p59_p6 = por %p58_p5, %p57_p4 }
   0xd   :  { %p60_p7 = pnand %p59_p6, %p53_p3 }
   0xf   :  { %63 = shalt.err (!%p60_p7)
}
  0x10   :  { %17 = dma.hbm_to_vmem [thread:$0]  %s126_s0, 256, %s15_s7, [#allocation3]  }
  0x11   :  { %86 = dma.done.wait [#allocation3], 256  }
  0x12   :  { %87 = vsyncadd [#allocation3], 4294967040  ;;  %s91_s18 = smov [#allocation5]   ;;  %v21_v0 = vld [vmem:[#allocation2] sm:$0xff]  ;;  %v22_v1 = vld [vmem:[#allocation2 + $0x8] sm:$0xff] }
  0x13   :  { %s31_s19 = sshll.u32 %s91_s18, 4  ;;  %23 = vst [vmem:[#allocation5] sm:$0xff] %v21_v0  ;;  %24 = vst [vmem:[#allocation5 + $0x8] sm:$0xff] %v22_v1  ;;  %s32_s19 = int_to_ptr.vmem [resolvable:$true] %s31_s19 }
  0x14   :  { %s64_s20 = scalar_lea.vmem %s32_s19, 256  ;;  %p69_p9 = scmp.lt.s32.totalorder %s32_s19, %s32_s19 }
  0x15   :  { %p65_p8 = scmp.ne.s32.totalorder %s32_s19, %s64_s20  ;;  %p70_p10 = scmp.lt.s32.totalorder %s64_s20, %s64_s20 }
  0x17   :  { %p71_p11 = por %p70_p10, %p69_p9 }
  0x19   :  { %p72_p12 = pnand %p71_p11, %p65_p8 }
  0x1b   :  { %75 = shalt.err (!%p72_p12)
}
  0x1c   :  { %s76_s0 = scalar_lea.hbm %s127_s1, 256 }
  0x1d   :  { %p77_p13 = scmp.ne.s32.totalorder %s127_s1, %s76_s0  ;;  %p80_p0 = scmp.lt.u32.totalorder %s76_s0, %s127_s1 }
  0x1f   :  { %p82_p1 = pnand %p80_p0, %p77_p13 }
  0x21   :  { %85 = shalt.err (!%p82_p1)
}
  0x22   :  { %34 = dma.vmem_to_hbm [thread:$0]  %s32_s19, 256, %s127_s1, [#allocation4]  }
  0x23   :  { %88 = dma.done.wait [#allocation4], 256  }
  0x24   :  { %89 = vsyncadd [#allocation4], 4294967040 }
  0x25   :  { %38 = vsyncpa [#allocation3], 1 }
  0x26   :  { %39 = vsyncpa [#allocation4], 1 }

</bundles_post_ra>
